<compile_context>
chip_gen: v7x
topology: tpu7x:2x2x1
jax: 0.10.0
libtpu: 0.0.40
codegen_flags: <defaults>
</compile_context>

<pallas_src>
import math
from functools import partial

import jax
import jax.numpy as jnp
from jax.experimental import pallas as pl
from jax.experimental.pallas import tpu as pltpu

_LANE = 128
# Row indices into the packed bias/scale slab (each row is _LANE wide).
_BQ, _BK, _BV, _BO, _G1, _BE1, _BF1, _BF2, _G2, _BE2, _BC = range(11)


def _layer_norm_padded(x, gamma, beta, h_real, eps=1e-12):
    """LayerNorm over the first `h_real` columns of a lane-padded [N,128] slab.

    Padded columns of x / gamma / beta are zero, so full-lane sums equal sums
    over the real hidden dim and padded output columns stay exactly zero.
    """
    mean = jnp.sum(x, axis=-1, keepdims=True) / h_real
    var = jnp.sum(x * x, axis=-1, keepdims=True) / h_real - mean * mean
    return (x - mean) * jax.lax.rsqrt(var + eps) * gamma + beta


def _gelu_tanh(x):
    # TODO(synk): HF BERT default is exact erf-GELU; tanh approximation used here.
    c = math.sqrt(2.0 / math.pi)
    return 0.5 * x * (1.0 + jnp.tanh(c * (x + 0.044715 * x * x * x)))


def sa_linear_kernel(ids_ref, x_ref,
                     wq_ref, wk_ref, wv_ref, wo_ref,
                     w1_ref, w2_ref, wc_ref, b_ref,
                     out_ref, *, hidden):
    B, S, HP = x_ref.shape
    N = B * S

    x = x_ref[...].reshape(N, HP)                       # [N, HP] f32 (padded cols 0)
    xb = x.astype(jnp.bfloat16)

    # attention_mask = zeros_like(input_ids); attention_mask[input_ids != 0] = 1
    mask = (ids_ref[...] != 0).astype(jnp.float32)      # [B, S]
    neg = (mask - 1.0)[:, None, :] * 1e9                # [B, 1, S] additive key mask

    def tok_mm(a_bf16, w_ref, brow):                    # per-token [N,HP] x [HP,*] + bias
        return (jnp.dot(a_bf16, w_ref[...], preferred_element_type=jnp.float32)
                + b_ref[brow:brow + 1, :])

    q = tok_mm(xb, wq_ref, _BQ).reshape(B, S, HP)
    k = tok_mm(xb, wk_ref, _BK).reshape(B, S, HP)
    v = tok_mm(xb, wv_ref, _BV).reshape(B, S, HP)

    scale = 1.0 / math.sqrt(hidden)
    # 'bqh,bkh->bqk' : contract last axes directly, no explicit k.T transpose.
    scores = jax.lax.dot_general(
        q.astype(jnp.bfloat16), k.astype(jnp.bfloat16),
        dimension_numbers=(((2,), (2,)), ((0,), (0,))),
        preferred_element_type=jnp.float32) * scale     # [B, S, S]
    scores = scores + neg

    m = jnp.max(scores, axis=-1, keepdims=True)
    e = jnp.exp(scores - m)                             # f32 softmax math
    p = e * pl.reciprocal(jnp.sum(e, axis=-1, keepdims=True), approx=True)

    # 'bqk,bkh->bqh'
    ctx = jax.lax.dot_general(
        p.astype(jnp.bfloat16), v.astype(jnp.bfloat16),
        dimension_numbers=(((2,), (1,)), ((0,), (0,))),
        preferred_element_type=jnp.float32)             # [B, S, HP]

    attn = tok_mm(ctx.reshape(N, HP).astype(jnp.bfloat16), wo_ref, _BO)
    h = _layer_norm_padded(x + attn,
                           b_ref[_G1:_G1 + 1, :], b_ref[_BE1:_BE1 + 1, :], hidden)

    ff = tok_mm(h.astype(jnp.bfloat16), w1_ref, _BF1)
    ff = _gelu_tanh(ff)                                 # f32 elementwise
    ff = tok_mm(ff.astype(jnp.bfloat16), w2_ref, _BF2)
    h2 = _layer_norm_padded(h + ff,
                            b_ref[_G2:_G2 + 1, :], b_ref[_BE2:_BE2 + 1, :], hidden)

    cls = h2.reshape(B, S, HP)[:, 0, :]                 # sequence_output[:, 0, :] -> [B, HP]
    # dropout(p) is identity in eval mode.
    logits = (jnp.dot(cls.astype(jnp.bfloat16), wc_ref[...],
                      preferred_element_type=jnp.float32)
              + b_ref[_BC:_BC + 1, :])                  # [B, 128] lane-dense store
    out_ref[...] = logits


def init_params(key, vocab=64, hidden=32, ffn=64, num_labels=4):
    ks = jax.random.split(key, 8)

    def lin(k, fan_in, shape):
        return jax.random.normal(k, shape, jnp.float32) / math.sqrt(fan_in)

    H, F, L = hidden, ffn, num_labels
    zeros = lambda n: jnp.zeros((1, n), jnp.float32)
    ones = lambda n: jnp.ones((1, n), jnp.float32)
    return dict(
        embed=lin(ks[0], H, (vocab, H)),
        wq=lin(ks[1], H, (H, H)), bq=zeros(H),
        wk=lin(ks[2], H, (H, H)), bk=zeros(H),
        wv=lin(ks[3], H, (H, H)), bv=zeros(H),
        wo=lin(ks[4], H, (H, H)), bo=zeros(H),
        g1=ones(H), be1=zeros(H),
        w1=lin(ks[5], H, (H, F)), bf1=zeros(F),
        w2=lin(ks[6], F, (F, H)), bf2=zeros(H),
        g2=ones(H), be2=zeros(H),
        wc=lin(ks[7], H, (H, L)), bc=zeros(L),
    )


def _pad_mat(w, rows, cols, dtype):
    out = jnp.zeros((rows, cols), dtype)
    return out.at[:w.shape[0], :w.shape[1]].set(w.astype(dtype))


def _pad_vec(v, width):
    v = jnp.asarray(v, jnp.float32).reshape(-1)
    return jnp.zeros((width,), jnp.float32).at[:v.shape[0]].set(v)


def sa_linear_forward(input_ids, params):
    B, S = input_ids.shape
    H = params["embed"].shape[1]
    F = params["w1"].shape[1]
    L = params["wc"].shape[1]
    HP = FP = LP = _LANE
    assert H <= HP and F <= FP and L <= LP

    # Glue outside the kernel: embedding gather, lane-padding, bf16 weight cast,
    # and packing all per-channel vectors into one (11, 128) f32 slab.
    x_emb = jnp.take(params["embed"], input_ids, axis=0).astype(jnp.float32)  # [B,S,H]
    x_emb = jnp.pad(x_emb, ((0, 0), (0, 0), (0, HP - H)))                     # [B,S,128]

    wq = _pad_mat(params["wq"], HP, HP, jnp.bfloat16)
    wk = _pad_mat(params["wk"], HP, HP, jnp.bfloat16)
    wv = _pad_mat(params["wv"], HP, HP, jnp.bfloat16)
    wo = _pad_mat(params["wo"], HP, HP, jnp.bfloat16)
    w1 = _pad_mat(params["w1"], HP, FP, jnp.bfloat16)
    w2 = _pad_mat(params["w2"], FP, HP, jnp.bfloat16)
    wc = _pad_mat(params["wc"], HP, LP, jnp.bfloat16)

    bias_slab = jnp.stack([
        _pad_vec(params["bq"], HP), _pad_vec(params["bk"], HP),
        _pad_vec(params["bv"], HP), _pad_vec(params["bo"], HP),
        _pad_vec(params["g1"], HP), _pad_vec(params["be1"], HP),
        _pad_vec(params["bf1"], FP), _pad_vec(params["bf2"], HP),
        _pad_vec(params["g2"], HP), _pad_vec(params["be2"], HP),
        _pad_vec(params["bc"], LP),
    ])                                                                        # [11, 128]

    ids = input_ids.astype(jnp.int32)                                         # [B, S]

    vmem = pl.BlockSpec(memory_space=pltpu.MemorySpace.VMEM)
    out = pl.pallas_call(
        partial(sa_linear_kernel, hidden=H),
        out_shape=jax.ShapeDtypeStruct((B, LP), jnp.float32),
        in_specs=[vmem] * 10,
        out_specs=vmem,
    )(ids, x_emb, wq, wk, wv, wo, w1, w2, wc, bias_slab)
    return out[:, :L]


if __name__ == "__main__":
    B, S, V, H, F, L = 2, 8, 64, 32, 64, 4

    key = jax.random.PRNGKey(0)
    k_param, k_ids = jax.random.split(key)
    params = init_params(k_param, vocab=V, hidden=H, ffn=F, num_labels=L)

    input_ids = jax.random.randint(k_ids, (B, S), 0, V, dtype=jnp.int32)
    # force some padding (id == 0) so the attention mask actually masks
    input_ids = input_ids.at[:, -2:].set(0)

    logits = sa_linear_forward(input_ids, params)
    jax.block_until_ready(logits)
    assert logits.shape == (B, L) and logits.dtype == jnp.float32
    assert bool(jnp.all(jnp.isfinite(logits)))
    print("KERNEL_OK")
</pallas_src>

<mosaic_0001>
module attributes {stable_mosaic.version = 11 : i64} {
  func.func @sa_linear_kernel(%arg0: memref<2x8xi32, #tpu.memory_space<vmem>>, %arg1: memref<2x8x128xf32, #tpu.memory_space<vmem>>, %arg2: memref<128x128xbf16, #tpu.memory_space<vmem>>, %arg3: memref<128x128xbf16, #tpu.memory_space<vmem>>, %arg4: memref<128x128xbf16, #tpu.memory_space<vmem>>, %arg5: memref<128x128xbf16, #tpu.memory_space<vmem>>, %arg6: memref<128x128xbf16, #tpu.memory_space<vmem>>, %arg7: memref<128x128xbf16, #tpu.memory_space<vmem>>, %arg8: memref<128x128xbf16, #tpu.memory_space<vmem>>, %arg9: memref<11x128xf32, #tpu.memory_space<vmem>>, %arg10: memref<2x128xf32, #tpu.memory_space<vmem>>) attributes {dimension_semantics = [], scalar_prefetch = 0 : i64, scratch_operands = 0 : i64, tpu.core_type = #tpu.core_type<tc>} {
    %c0 = arith.constant 0 : index
    %c0_0 = arith.constant 0 : index
    %c0_1 = arith.constant 0 : index
    %0 = vector.load %arg1[%c0, %c0_0, %c0_1] : memref<2x8x128xf32, #tpu.memory_space<vmem>>, vector<2x8x128xf32>
    %1 = vector.shape_cast %0 : vector<2x8x128xf32> to vector<16x128xf32>
    %2 = arith.truncf %1 : vector<16x128xf32> to vector<16x128xbf16>
    %c0_2 = arith.constant 0 : index
    %c0_3 = arith.constant 0 : index
    %3 = vector.load %arg0[%c0_2, %c0_3] : memref<2x8xi32, #tpu.memory_space<vmem>>, vector<2x8xi32>
    %c0_i32 = arith.constant 0 : i32
    %4 = vector.broadcast %c0_i32 : i32 to vector<2x8xi32>
    %5 = arith.cmpi ne, %3, %4 : vector<2x8xi32>
    %6 = arith.extui %5 : vector<2x8xi1> to vector<2x8xi32>
    %7 = arith.sitofp %6 : vector<2x8xi32> to vector<2x8xf32>
    %cst = arith.constant 1.000000e+00 : f32
    %8 = vector.broadcast %cst : f32 to vector<2x8xf32>
    %9 = arith.subf %7, %8 : vector<2x8xf32>
    %10 = vector.shape_cast %9 : vector<2x8xf32> to vector<2x1x8xf32>
    %cst_4 = arith.constant 1.000000e+09 : f32
    %11 = vector.broadcast %cst_4 : f32 to vector<2x1x8xf32>
    %12 = arith.mulf %10, %11 : vector<2x1x8xf32>
    %c0_5 = arith.constant 0 : index
    %c0_6 = arith.constant 0 : index
    %13 = vector.load %arg2[%c0_5, %c0_6] : memref<128x128xbf16, #tpu.memory_space<vmem>>, vector<128x128xbf16>
    %cst_7 = arith.constant dense<0.000000e+00> : vector<16x128xf32>
    %14 = tpu.matmul %2, %13, %cst_7 {dimension_numbers = #tpu.dot_dimension_numbers<[1], [0], [0], [1], [0, 0, 1, 1], [], []>} : vector<16x128xbf16>, vector<128x128xbf16>, vector<16x128xf32> -> vector<16x128xf32>
    %c0_8 = arith.constant 0 : index
    %c0_9 = arith.constant 0 : index
    %15 = vector.load %arg9[%c0_8, %c0_9] : memref<11x128xf32, #tpu.memory_space<vmem>>, vector<1x128xf32>
    %16 = vector.broadcast %15 : vector<1x128xf32> to vector<16x128xf32>
    %17 = arith.addf %14, %16 : vector<16x128xf32>
    %18 = vector.shape_cast %17 : vector<16x128xf32> to vector<2x8x128xf32>
    %c0_10 = arith.constant 0 : index
    %c0_11 = arith.constant 0 : index
    %19 = vector.load %arg3[%c0_10, %c0_11] : memref<128x128xbf16, #tpu.memory_space<vmem>>, vector<128x128xbf16>
    %cst_12 = arith.constant dense<0.000000e+00> : vector<16x128xf32>
    %20 = tpu.matmul %2, %19, %cst_12 {dimension_numbers = #tpu.dot_dimension_numbers<[1], [0], [0], [1], [0, 0, 1, 1], [], []>} : vector<16x128xbf16>, vector<128x128xbf16>, vector<16x128xf32> -> vector<16x128xf32>
    %c1 = arith.constant 1 : index
    %c0_13 = arith.constant 0 : index
    %21 = vector.load %arg9[%c1, %c0_13] : memref<11x128xf32, #tpu.memory_space<vmem>>, vector<1x128xf32>
    %22 = vector.broadcast %21 : vector<1x128xf32> to vector<16x128xf32>
    %23 = arith.addf %20, %22 : vector<16x128xf32>
    %24 = vector.shape_cast %23 : vector<16x128xf32> to vector<2x8x128xf32>
    %c0_14 = arith.constant 0 : index
    %c0_15 = arith.constant 0 : index
    %25 = vector.load %arg4[%c0_14, %c0_15] : memref<128x128xbf16, #tpu.memory_space<vmem>>, vector<128x128xbf16>
    %cst_16 = arith.constant dense<0.000000e+00> : vector<16x128xf32>
    %26 = tpu.matmul %2, %25, %cst_16 {dimension_numbers = #tpu.dot_dimension_numbers<[1], [0], [0], [1], [0, 0, 1, 1], [], []>} : vector<16x128xbf16>, vector<128x128xbf16>, vector<16x128xf32> -> vector<16x128xf32>
    %c2 = arith.constant 2 : index
    %c0_17 = arith.constant 0 : index
    %27 = vector.load %arg9[%c2, %c0_17] : memref<11x128xf32, #tpu.memory_space<vmem>>, vector<1x128xf32>
    %28 = vector.broadcast %27 : vector<1x128xf32> to vector<16x128xf32>
    %29 = arith.addf %26, %28 : vector<16x128xf32>
    %30 = vector.shape_cast %29 : vector<16x128xf32> to vector<2x8x128xf32>
    %31 = arith.truncf %18 : vector<2x8x128xf32> to vector<2x8x128xbf16>
    %32 = arith.truncf %24 : vector<2x8x128xf32> to vector<2x8x128xbf16>
    %cst_18 = arith.constant dense<0.000000e+00> : vector<2x8x8xf32>
    %33 = tpu.matmul %31, %32, %cst_18 {dimension_numbers = #tpu.dot_dimension_numbers<[2], [2], [1], [1], [0, 0, 0, 1, 1, 1], [0], [0]>} : vector<2x8x128xbf16>, vector<2x8x128xbf16>, vector<2x8x8xf32> -> vector<2x8x8xf32>
    %cst_19 = arith.constant 0.176776692 : f32
    %34 = vector.broadcast %cst_19 : f32 to vector<2x8x8xf32>
    %35 = arith.mulf %33, %34 : vector<2x8x8xf32>
    %36 = vector.broadcast %12 : vector<2x1x8xf32> to vector<2x8x8xf32>
    %37 = arith.addf %35, %36 : vector<2x8x8xf32>
    %cst_20 = arith.constant dense<0xFF800000> : vector<2x8xf32>
    %38 = vector.multi_reduction <maximumf>, %37, %cst_20 [2] : vector<2x8x8xf32> to vector<2x8xf32>
    %39 = vector.shape_cast %38 : vector<2x8xf32> to vector<2x8x1xf32>
    %40 = vector.broadcast %39 : vector<2x8x1xf32> to vector<2x8x8xf32>
    %41 = arith.subf %37, %40 : vector<2x8x8xf32>
    %42 = math.exp %41 : vector<2x8x8xf32>
    %cst_21 = arith.constant dense<0.000000e+00> : vector<2x8xf32>
    %43 = vector.multi_reduction <add>, %42, %cst_21 [2] : vector<2x8x8xf32> to vector<2x8xf32>
    %44 = vector.shape_cast %43 : vector<2x8xf32> to vector<2x8x1xf32>
    %45 = tpu.reciprocal %44 {approx = true} : vector<2x8x1xf32> -> vector<2x8x1xf32>
    %46 = vector.broadcast %45 : vector<2x8x1xf32> to vector<2x8x8xf32>
    %47 = arith.mulf %42, %46 : vector<2x8x8xf32>
    %48 = arith.truncf %47 : vector<2x8x8xf32> to vector<2x8x8xbf16>
    %49 = arith.truncf %30 : vector<2x8x128xf32> to vector<2x8x128xbf16>
    %cst_22 = arith.constant dense<0.000000e+00> : vector<2x8x128xf32>
    %50 = tpu.matmul %48, %49, %cst_22 {dimension_numbers = #tpu.dot_dimension_numbers<[2], [1], [1], [2], [0, 0, 0, 1, 1, 2], [0], [0]>} : vector<2x8x8xbf16>, vector<2x8x128xbf16>, vector<2x8x128xf32> -> vector<2x8x128xf32>
    %51 = vector.shape_cast %50 : vector<2x8x128xf32> to vector<16x128xf32>
    %52 = arith.truncf %51 : vector<16x128xf32> to vector<16x128xbf16>
    %c0_23 = arith.constant 0 : index
    %c0_24 = arith.constant 0 : index
    %53 = vector.load %arg5[%c0_23, %c0_24] : memref<128x128xbf16, #tpu.memory_space<vmem>>, vector<128x128xbf16>
    %cst_25 = arith.constant dense<0.000000e+00> : vector<16x128xf32>
    %54 = tpu.matmul %52, %53, %cst_25 {dimension_numbers = #tpu.dot_dimension_numbers<[1], [0], [0], [1], [0, 0, 1, 1], [], []>} : vector<16x128xbf16>, vector<128x128xbf16>, vector<16x128xf32> -> vector<16x128xf32>
    %c3 = arith.constant 3 : index
    %c0_26 = arith.constant 0 : index
    %55 = vector.load %arg9[%c3, %c0_26] : memref<11x128xf32, #tpu.memory_space<vmem>>, vector<1x128xf32>
    %56 = vector.broadcast %55 : vector<1x128xf32> to vector<16x128xf32>
    %57 = arith.addf %54, %56 : vector<16x128xf32>
    %58 = arith.addf %1, %57 : vector<16x128xf32>
    %c4 = arith.constant 4 : index
    %c0_27 = arith.constant 0 : index
    %59 = vector.load %arg9[%c4, %c0_27] : memref<11x128xf32, #tpu.memory_space<vmem>>, vector<1x128xf32>
    %c5 = arith.constant 5 : index
    %c0_28 = arith.constant 0 : index
    %60 = vector.load %arg9[%c5, %c0_28] : memref<11x128xf32, #tpu.memory_space<vmem>>, vector<1x128xf32>
    %cst_29 = arith.constant dense<0.000000e+00> : vector<16xf32>
    %61 = vector.multi_reduction <add>, %58, %cst_29 [1] : vector<16x128xf32> to vector<16xf32>
    %62 = vector.shape_cast %61 : vector<16xf32> to vector<16x1xf32>
    %cst_30 = arith.constant 3.200000e+01 : f32
    %63 = vector.broadcast %cst_30 : f32 to vector<16x1xf32>
    %64 = arith.divf %62, %63 : vector<16x1xf32>
    %65 = arith.mulf %58, %58 : vector<16x128xf32>
    %cst_31 = arith.constant dense<0.000000e+00> : vector<16xf32>
    %66 = vector.multi_reduction <add>, %65, %cst_31 [1] : vector<16x128xf32> to vector<16xf32>
    %67 = vector.shape_cast %66 : vector<16xf32> to vector<16x1xf32>
    %cst_32 = arith.constant 3.200000e+01 : f32
    %68 = vector.broadcast %cst_32 : f32 to vector<16x1xf32>
    %69 = arith.divf %67, %68 : vector<16x1xf32>
    %70 = arith.mulf %64, %64 : vector<16x1xf32>
    %71 = arith.subf %69, %70 : vector<16x1xf32>
    %72 = vector.broadcast %64 : vector<16x1xf32> to vector<16x128xf32>
    %73 = arith.subf %58, %72 : vector<16x128xf32>
    %cst_33 = arith.constant 9.99999996E-13 : f32
    %74 = vector.broadcast %cst_33 : f32 to vector<16x1xf32>
    %75 = arith.addf %71, %74 : vector<16x1xf32>
    %76 = math.rsqrt %75 : vector<16x1xf32>
    %77 = vector.broadcast %76 : vector<16x1xf32> to vector<16x128xf32>
    %78 = arith.mulf %73, %77 : vector<16x128xf32>
    %79 = vector.broadcast %59 : vector<1x128xf32> to vector<16x128xf32>
    %80 = arith.mulf %78, %79 : vector<16x128xf32>
    %81 = vector.broadcast %60 : vector<1x128xf32> to vector<16x128xf32>
    %82 = arith.addf %80, %81 : vector<16x128xf32>
    %83 = arith.truncf %82 : vector<16x128xf32> to vector<16x128xbf16>
    %c0_34 = arith.constant 0 : index
    %c0_35 = arith.constant 0 : index
    %84 = vector.load %arg6[%c0_34, %c0_35] : memref<128x128xbf16, #tpu.memory_space<vmem>>, vector<128x128xbf16>
    %cst_36 = arith.constant dense<0.000000e+00> : vector<16x128xf32>
    %85 = tpu.matmul %83, %84, %cst_36 {dimension_numbers = #tpu.dot_dimension_numbers<[1], [0], [0], [1], [0, 0, 1, 1], [], []>} : vector<16x128xbf16>, vector<128x128xbf16>, vector<16x128xf32> -> vector<16x128xf32>
    %c6 = arith.constant 6 : index
    %c0_37 = arith.constant 0 : index
    %86 = vector.load %arg9[%c6, %c0_37] : memref<11x128xf32, #tpu.memory_space<vmem>>, vector<1x128xf32>
    %87 = vector.broadcast %86 : vector<1x128xf32> to vector<16x128xf32>
    %88 = arith.addf %85, %87 : vector<16x128xf32>
    %cst_38 = arith.constant 5.000000e-01 : f32
    %89 = vector.broadcast %cst_38 : f32 to vector<16x128xf32>
    %90 = arith.mulf %89, %88 : vector<16x128xf32>
    %cst_39 = arith.constant 4.471500e-02 : f32
    %91 = vector.broadcast %cst_39 : f32 to vector<16x128xf32>
    %92 = arith.mulf %91, %88 : vector<16x128xf32>
    %93 = arith.mulf %92, %88 : vector<16x128xf32>
    %94 = arith.mulf %93, %88 : vector<16x128xf32>
    %95 = arith.addf %88, %94 : vector<16x128xf32>
    %cst_40 = arith.constant 0.797884583 : f32
    %96 = vector.broadcast %cst_40 : f32 to vector<16x128xf32>
    %97 = arith.mulf %96, %95 : vector<16x128xf32>
    %98 = math.tanh %97 : vector<16x128xf32>
    %cst_41 = arith.constant 1.000000e+00 : f32
    %99 = vector.broadcast %cst_41 : f32 to vector<16x128xf32>
    %100 = arith.addf %99, %98 : vector<16x128xf32>
    %101 = arith.mulf %90, %100 : vector<16x128xf32>
    %102 = arith.truncf %101 : vector<16x128xf32> to vector<16x128xbf16>
    %c0_42 = arith.constant 0 : index
    %c0_43 = arith.constant 0 : index
    %103 = vector.load %arg7[%c0_42, %c0_43] : memref<128x128xbf16, #tpu.memory_space<vmem>>, vector<128x128xbf16>
    %cst_44 = arith.constant dense<0.000000e+00> : vector<16x128xf32>
    %104 = tpu.matmul %102, %103, %cst_44 {dimension_numbers = #tpu.dot_dimension_numbers<[1], [0], [0], [1], [0, 0, 1, 1], [], []>} : vector<16x128xbf16>, vector<128x128xbf16>, vector<16x128xf32> -> vector<16x128xf32>
    %c7 = arith.constant 7 : index
    %c0_45 = arith.constant 0 : index
    %105 = vector.load %arg9[%c7, %c0_45] : memref<11x128xf32, #tpu.memory_space<vmem>>, vector<1x128xf32>
    %106 = vector.broadcast %105 : vector<1x128xf32> to vector<16x128xf32>
    %107 = arith.addf %104, %106 : vector<16x128xf32>
    %108 = arith.addf %82, %107 : vector<16x128xf32>
    %c8 = arith.constant 8 : index
    %c0_46 = arith.constant 0 : index
    %109 = vector.load %arg9[%c8, %c0_46] : memref<11x128xf32, #tpu.memory_space<vmem>>, vector<1x128xf32>
    %c9 = arith.constant 9 : index
    %c0_47 = arith.constant 0 : index
    %110 = vector.load %arg9[%c9, %c0_47] : memref<11x128xf32, #tpu.memory_space<vmem>>, vector<1x128xf32>
    %cst_48 = arith.constant dense<0.000000e+00> : vector<16xf32>
    %111 = vector.multi_reduction <add>, %108, %cst_48 [1] : vector<16x128xf32> to vector<16xf32>
    %112 = vector.shape_cast %111 : vector<16xf32> to vector<16x1xf32>
    %cst_49 = arith.constant 3.200000e+01 : f32
    %113 = vector.broadcast %cst_49 : f32 to vector<16x1xf32>
    %114 = arith.divf %112, %113 : vector<16x1xf32>
    %115 = arith.mulf %108, %108 : vector<16x128xf32>
    %cst_50 = arith.constant dense<0.000000e+00> : vector<16xf32>
    %116 = vector.multi_reduction <add>, %115, %cst_50 [1] : vector<16x128xf32> to vector<16xf32>
    %117 = vector.shape_cast %116 : vector<16xf32> to vector<16x1xf32>
    %cst_51 = arith.constant 3.200000e+01 : f32
    %118 = vector.broadcast %cst_51 : f32 to vector<16x1xf32>
    %119 = arith.divf %117, %118 : vector<16x1xf32>
    %120 = arith.mulf %114, %114 : vector<16x1xf32>
    %121 = arith.subf %119, %120 : vector<16x1xf32>
    %122 = vector.broadcast %114 : vector<16x1xf32> to vector<16x128xf32>
    %123 = arith.subf %108, %122 : vector<16x128xf32>
    %cst_52 = arith.constant 9.99999996E-13 : f32
    %124 = vector.broadcast %cst_52 : f32 to vector<16x1xf32>
    %125 = arith.addf %121, %124 : vector<16x1xf32>
    %126 = math.rsqrt %125 : vector<16x1xf32>
    %127 = vector.broadcast %126 : vector<16x1xf32> to vector<16x128xf32>
    %128 = arith.mulf %123, %127 : vector<16x128xf32>
    %129 = vector.broadcast %109 : vector<1x128xf32> to vector<16x128xf32>
    %130 = arith.mulf %128, %129 : vector<16x128xf32>
    %131 = vector.broadcast %110 : vector<1x128xf32> to vector<16x128xf32>
    %132 = arith.addf %130, %131 : vector<16x128xf32>
    %133 = vector.shape_cast %132 : vector<16x128xf32> to vector<2x8x128xf32>
    %134 = vector.extract_strided_slice %133 {offsets = [0, 0, 0], sizes = [2, 1, 128], strides = [1, 1, 1]} : vector<2x8x128xf32> to vector<2x1x128xf32>
    %135 = vector.shape_cast %134 : vector<2x1x128xf32> to vector<2x128xf32>
    %136 = arith.truncf %135 : vector<2x128xf32> to vector<2x128xbf16>
    %c0_53 = arith.constant 0 : index
    %c0_54 = arith.constant 0 : index
    %137 = vector.load %arg8[%c0_53, %c0_54] : memref<128x128xbf16, #tpu.memory_space<vmem>>, vector<128x128xbf16>
    %cst_55 = arith.constant dense<0.000000e+00> : vector<2x128xf32>
    %138 = tpu.matmul %136, %137, %cst_55 {dimension_numbers = #tpu.dot_dimension_numbers<[1], [0], [0], [1], [0, 0, 1, 1], [], []>} : vector<2x128xbf16>, vector<128x128xbf16>, vector<2x128xf32> -> vector<2x128xf32>
    %c10 = arith.constant 10 : index
    %c0_56 = arith.constant 0 : index
    %139 = vector.load %arg9[%c10, %c0_56] : memref<11x128xf32, #tpu.memory_space<vmem>>, vector<1x128xf32>
    %140 = vector.broadcast %139 : vector<1x128xf32> to vector<2x128xf32>
    %141 = arith.addf %138, %140 : vector<2x128xf32>
    %c0_57 = arith.constant 0 : index
    %c0_58 = arith.constant 0 : index
    %142 = vector.load %arg10[%c0_57, %c0_58] : memref<2x128xf32, #tpu.memory_space<vmem>>, vector<2x128xf32>
    tpu.vector_store %arg10[%c0_57, %c0_58], %141 {strides = array<i32>} : memref<2x128xf32, #tpu.memory_space<vmem>>, vector<2x128xf32>,
    return
  }
}

</mosaic_0001>

<bundles_post_ra>
// kernel: tpu_custom_call.1
= control target key start
LH: loop header
LB: loop body
LE: loop exit
PB: predicated region body
PF: predicated region fallthrough
CT: control target
= control target key end

     0   :  { %15 = vsyncpa [#allocation3], 0  ;;  %s2296_s0 = inlined_call_operand.hbm [shape: s32[2,8], index: 0, kind: input, shape index: {}]   ;;  %s2297_s1 = inlined_call_operand.hbm [shape: f32[2,8,128], index: 1, kind: input, shape index: {}]   ;;  %s2298_s2 = inlined_call_operand.hbm [shape: bf16[128,128], index: 2, kind: input, shape index: {}]   ;;  %s2299_s3 = inlined_call_operand.hbm [shape: bf16[128,128], index: 3, kind: input, shape index: {}]   ;;  %s2300_s4 = inlined_call_operand.hbm [shape: bf16[128,128], index: 4, kind: input, shape index: {}]   ;;  %s2301_s5 = inlined_call_operand.hbm [shape: bf16[128,128], index: 5, kind: input, shape index: {}]   ;;  %s2302_s6 = inlined_call_operand.hbm [shape: bf16[128,128], index: 6, kind: input, shape index: {}]   ;;  %s2303_s7 = inlined_call_operand.hbm [shape: bf16[128,128], index: 7, kind: input, shape index: {}]   ;;  %s2304_s8 = inlined_call_operand.hbm [shape: bf16[128,128], index: 8, kind: input, shape index: {}]   ;;  %s2305_s9 = inlined_call_operand.vmem [shape: f32[11,128], index: 9, kind: input, shape index: {}]   ;;  %s2306_s10 = inlined_call_operand.hbm [shape: f32[2,128], index: 10, kind: output, shape index: {}]  }
   0x1   :  { %16 = vsyncpa [#allocation6], 0 }
   0x2   :  { %17 = vsyncpa [#allocation9], 0 }
   0x3   :  { %18 = vsyncpa [#allocation12], 0 }
   0x4   :  { %19 = vsyncpa [#allocation15], 0 }
   0x5   :  { %20 = vsyncpa [#allocation4], 0  ;;  %s1949_s13 = smov [#allocation5]   ;;  %s1717_s17 = scalar_lea.hbm %s2297_s1, 256 }
   0x6   :  { %s36_s14 = sshll.u32 %s1949_s13, 4  ;;  %p1718_p0 = scmp.ne.s32.totalorder %s2297_s1, %s1717_s17  ;;  %s37_s14 = int_to_ptr.vmem [resolvable:$true] %s36_s14 }
   0x7   :  { %p1721_p1 = scmp.lt.u32.totalorder %s1717_s17, %s2297_s1 }
   0x9   :  { %p1723_p2 = pnand %p1721_p1, %p1718_p0 }
   0xb   :  { %1726 = shalt.err (!%p1723_p2)
}
   0xc   :  { %s1727_s22 = scalar_lea.vmem %s37_s14, 256  ;;  %p1732_p4 = scmp.lt.s32.totalorder %s37_s14, %s37_s14 }
   0xd   :  { %p1728_p3 = scmp.ne.s32.totalorder %s37_s14, %s1727_s22  ;;  %p1733_p5 = scmp.lt.s32.totalorder %s1727_s22, %s1727_s22 }
   0xf   :  { %p1734_p6 = por %p1733_p5, %p1732_p4 }
  0x11   :  { %p1735_p7 = pnand %p1734_p6, %p1728_p3 }
  0x13   :  { %1738 = shalt.err (!%p1735_p7)
}
  0x14   :  { %s1950_s23 = smov 128   ;;  %s1951_s24 = smov 8  }
  0x15   :  { %42 = dma.hbm_to_vmem [thread:$0]  %s2297_s1, 256, %s37_s14, [#allocation6], %s1950_s23, %s1950_s23, %s1951_s24  }
  0x16   :  { %s1952_s27 = smov [#allocation8]   ;;  %s1953_s29 = smov [#allocation11]  }
  0x17   :  { %s60_s28 = sshll.u32 %s1952_s27, 4  ;;  %s84_s30 = sshll.u32 %s1953_s29, 4  ;;  %s61_s28 = int_to_ptr.vmem [resolvable:$true] %s60_s28  ;;  %s85_s30 = int_to_ptr.vmem [resolvable:$true] %s84_s30 }
  0x18   :  { %s1739_s13 = scalar_lea.hbm %s2299_s3, 1024 }
  0x19   :  { %p1740_p8 = scmp.ne.s32.totalorder %s2299_s3, %s1739_s13  ;;  %p1743_p9 = scmp.lt.u32.totalorder %s1739_s13, %s2299_s3 }
  0x1b   :  { %p1745_p10 = pnand %p1743_p9, %p1740_p8 }
  0x1d   :  { %1748 = shalt.err (!%p1745_p10)
}
  0x1e   :  { %s1749_s1 = scalar_lea.vmem %s61_s28, 1024  ;;  %p1754_p12 = scmp.lt.s32.totalorder %s61_s28, %s61_s28 }
  0x1f   :  { %p1750_p11 = scmp.ne.s32.totalorder %s61_s28, %s1749_s1  ;;  %p1755_p13 = scmp.lt.s32.totalorder %s1749_s1, %s1749_s1 }
  0x21   :  { %p1756_p0 = por %p1755_p13, %p1754_p12 }
  0x23   :  { %p1757_p1 = pnand %p1756_p0, %p1750_p11 }
  0x25   :  { %1760 = shalt.err (!%p1757_p1)
}
  0x26   :  { %s1954_s14 = smov 64   ;;  %s1955_s19 = smov 4  }
  0x27   :  { %66 = dma.hbm_to_vmem [thread:$0]  %s2299_s3, 1024, %s61_s28, [#allocation9], %s1954_s14, %s1954_s14, %s1955_s19  }
  0x28   :  { %s1761_s24 = scalar_lea.hbm %s2301_s5, 1024 }
  0x29   :  { %p1762_p2 = scmp.ne.s32.totalorder %s2301_s5, %s1761_s24  ;;  %p1765_p3 = scmp.lt.u32.totalorder %s1761_s24, %s2301_s5 }
  0x2b   :  { %p1767_p4 = pnand %p1765_p3, %p1762_p2 }
  0x2d   :  { %1770 = shalt.err (!%p1767_p4)
}
  0x2e   :  { %s1771_s11 = scalar_lea.vmem %s85_s30, 1024  ;;  %p1776_p6 = scmp.lt.s32.totalorder %s85_s30, %s85_s30 }
  0x2f   :  { %p1772_p5 = scmp.ne.s32.totalorder %s85_s30, %s1771_s11  ;;  %p1777_p7 = scmp.lt.s32.totalorder %s1771_s11, %s1771_s11 }
  0x31   :  { %p1778_p8 = por %p1777_p7, %p1776_p6 }
  0x33   :  { %p1779_p9 = pnand %p1778_p8, %p1772_p5 }
  0x35   :  { %1782 = shalt.err (!%p1779_p9)
}
  0x36   :  { %90 = dma.hbm_to_vmem [thread:$0]  %s2301_s5, 1024, %s85_s30, [#allocation12], %s1954_s14, %s1954_s14, %s1955_s19  }
  0x37   :  { %s1956_s12 = smov [#allocation14]   ;;  %s1957_s15 = smov [#allocation2]  }
  0x38   :  { %s108_s13 = sshll.u32 %s1956_s12, 4  ;;  %s27_s16 = sshll.u32 %s1957_s15, 4  ;;  %s109_s13 = int_to_ptr.vmem [resolvable:$true] %s108_s13  ;;  %s28_s16 = int_to_ptr.vmem [resolvable:$true] %s27_s16 }
  0x39   :  { %s1783_s1 = scalar_lea.hbm %s2303_s7, 1024 }
  0x3a   :  { %p1784_p10 = scmp.ne.s32.totalorder %s2303_s7, %s1783_s1  ;;  %p1787_p11 = scmp.lt.u32.totalorder %s1783_s1, %s2303_s7 }
  0x3c   :  { %p1789_p12 = pnand %p1787_p11, %p1784_p10 }
  0x3e   :  { %1792 = shalt.err (!%p1789_p12)
}
  0x3f   :  { %s1793_s5 = scalar_lea.vmem %s109_s13, 1024  ;;  %p1798_p0 = scmp.lt.s32.totalorder %s109_s13, %s109_s13 }
  0x40   :  { %p1794_p13 = scmp.ne.s32.totalorder %s109_s13, %s1793_s5  ;;  %p1799_p1 = scmp.lt.s32.totalorder %s1793_s5, %s1793_s5 }
  0x42   :  { %p1800_p2 = por %p1799_p1, %p1798_p0 }
  0x44   :  { %p1801_p3 = pnand %p1800_p2, %p1794_p13 }
  0x46   :  { %1804 = shalt.err (!%p1801_p3)
}
  0x47   :  { %114 = dma.hbm_to_vmem [thread:$0]  %s2303_s7, 1024, %s109_s13, [#allocation15], %s1954_s14, %s1954_s14, %s1955_s19  }
  0x48   :  { %s1805_s27 = scalar_lea.hbm %s2296_s0, 32 }
  0x49   :  { %p1806_p4 = scmp.ne.s32.totalorder %s2296_s0, %s1805_s27  ;;  %p1809_p5 = scmp.lt.u32.totalorder %s1805_s27, %s2296_s0 }
  0x4b   :  { %p1811_p6 = pnand %p1809_p5, %p1806_p4 }
  0x4d   :  { %1814 = shalt.err (!%p1811_p6)
}
  0x4e   :  { %s1815_s12 = scalar_lea.vmem %s28_s16, 32  ;;  %p1820_p8 = scmp.lt.s32.totalorder %s28_s16, %s28_s16 }
  0x4f   :  { %p1816_p7 = scmp.ne.s32.totalorder %s28_s16, %s1815_s12  ;;  %p1821_p9 = scmp.lt.s32.totalorder %s1815_s12, %s1815_s12 }
  0x51   :  { %p1822_p10 = por %p1821_p9, %p1820_p8 }
  0x53   :  { %p1823_p11 = pnand %p1822_p10, %p1816_p7 }
  0x55   :  { %1826 = shalt.err (!%p1823_p11)
}
  0x56   :  { %30 = dma.hbm_to_vmem [thread:$0]  %s2296_s0, 32, %s28_s16, [#allocation3]  }
  0x57   :  { %s1958_s15 = smov [#allocation7]   ;;  %s1959_s18 = smov [#allocation10]  }
  0x58   :  { %s48_s17 = sshll.u32 %s1958_s15, 4  ;;  %s72_s1 = sshll.u32 %s1959_s18, 4  ;;  %s49_s17 = int_to_ptr.vmem [resolvable:$true] %s48_s17  ;;  %s73_s1 = int_to_ptr.vmem [resolvable:$true] %s72_s1 }
  0x59   :  { %s1827_s22 = scalar_lea.hbm %s2298_s2, 1024 }
  0x5a   :  { %p1828_p12 = scmp.ne.s32.totalorder %s2298_s2, %s1827_s22  ;;  %p1831_p13 = scmp.lt.u32.totalorder %s1827_s22, %s2298_s2 }
  0x5c   :  { %p1833_p0 = pnand %p1831_p13, %p1828_p12 }
  0x5e   :  { %1836 = shalt.err (!%p1833_p0)
}
  0x5f   :  { %s1837_s0 = scalar_lea.vmem %s49_s17, 1024  ;;  %p1842_p2 = scmp.lt.s32.totalorder %s49_s17, %s49_s17 }
  0x60   :  { %p1838_p1 = scmp.ne.s32.totalorder %s49_s17, %s1837_s0  ;;  %p1843_p3 = scmp.lt.s32.totalorder %s1837_s0, %s1837_s0 }
  0x62   :  { %p1844_p4 = por %p1843_p3, %p1842_p2 }
  0x64   :  { %p1845_p5 = pnand %p1844_p4, %p1838_p1 }
  0x66   :  { %1848 = shalt.err (!%p1845_p5)
}
  0x67   :  { %54 = dma.hbm_to_vmem [thread:$0]  %s2298_s2, 1024, %s49_s17, [#allocation6], %s1954_s14, %s1954_s14, %s1955_s19  }
  0x68   :  { %s1849_s29 = scalar_lea.hbm %s2300_s4, 1024 }
  0x69   :  { %p1850_p6 = scmp.ne.s32.totalorder %s2300_s4, %s1849_s29  ;;  %p1853_p7 = scmp.lt.u32.totalorder %s1849_s29, %s2300_s4 }
  0x6b   :  { %p1855_p8 = pnand %p1853_p7, %p1850_p6 }
  0x6d   :  { %1858 = shalt.err (!%p1855_p8)
}
  0x6e   :  { %s1859_s7 = scalar_lea.vmem %s73_s1, 1024  ;;  %p1864_p10 = scmp.lt.s32.totalorder %s73_s1, %s73_s1 }
  0x6f   :  { %p1860_p9 = scmp.ne.s32.totalorder %s73_s1, %s1859_s7  ;;  %p1865_p11 = scmp.lt.s32.totalorder %s1859_s7, %s1859_s7 }
  0x71   :  { %p1866_p12 = por %p1865_p11, %p1864_p10 }
  0x73   :  { %p1867_p13 = pnand %p1866_p12, %p1860_p9 }
  0x75   :  { %1870 = shalt.err (!%p1867_p13)
}
  0x76   :  { %78 = dma.hbm_to_vmem [thread:$0]  %s2300_s4, 1024, %s73_s1, [#allocation9], %s1954_s14, %s1954_s14, %s1955_s19  }
  0x77   :  { %s1960_s15 = smov [#allocation13]   ;;  %s1961_s18 = smov [#allocation16]  }
  0x78   :  { %s96_s17 = sshll.u32 %s1960_s15, 4  ;;  %s120_s20 = sshll.u32 %s1961_s18, 4  ;;  %s97_s17 = int_to_ptr.vmem [resolvable:$true] %s96_s17  ;;  %s121_s20 = int_to_ptr.vmem [resolvable:$true] %s120_s20 }
  0x79   :  { %s1871_s23 = scalar_lea.hbm %s2302_s6, 1024 }
  0x7a   :  { %p1872_p0 = scmp.ne.s32.totalorder %s2302_s6, %s1871_s23  ;;  %p1875_p1 = scmp.lt.u32.totalorder %s1871_s23, %s2302_s6 }
  0x7c   :  { %p1877_p2 = pnand %p1875_p1, %p1872_p0 }
  0x7e   :  { %1880 = shalt.err (!%p1877_p2)
}
  0x7f   :  { %s1881_s4 = scalar_lea.vmem %s97_s17, 1024  ;;  %p1886_p4 = scmp.lt.s32.totalorder %s97_s17, %s97_s17 }
  0x80   :  { %p1882_p3 = scmp.ne.s32.totalorder %s97_s17, %s1881_s4  ;;  %p1887_p5 = scmp.lt.s32.totalorder %s1881_s4, %s1881_s4 }
  0x82   :  { %p1888_p6 = por %p1887_p5, %p1886_p4 }
  0x84   :  { %p1889_p7 = pnand %p1888_p6, %p1882_p3 }
  0x86   :  { %1892 = shalt.err (!%p1889_p7)
}
  0x87   :  { %102 = dma.hbm_to_vmem [thread:$0]  %s2302_s6, 1024, %s97_s17, [#allocation12], %s1954_s14, %s1954_s14, %s1955_s19  }
  0x88   :  { %s1893_s27 = scalar_lea.hbm %s2304_s8, 1024 }
  0x89   :  { %p1894_p8 = scmp.ne.s32.totalorder %s2304_s8, %s1893_s27  ;;  %p1897_p9 = scmp.lt.u32.totalorder %s1893_s27, %s2304_s8 }
  0x8b   :  { %p1899_p10 = pnand %p1897_p9, %p1894_p8 }
  0x8d   :  { %1902 = shalt.err (!%p1899_p10)
}
  0x8e   :  { %s1903_s12 = scalar_lea.vmem %s121_s20, 1024  ;;  %p1908_p12 = scmp.lt.s32.totalorder %s121_s20, %s121_s20 }
  0x8f   :  { %p1904_p11 = scmp.ne.s32.totalorder %s121_s20, %s1903_s12  ;;  %p1909_p13 = scmp.lt.s32.totalorder %s1903_s12, %s1903_s12 }
  0x91   :  { %p1910_p0 = por %p1909_p13, %p1908_p12 }
  0x93   :  { %p1911_p1 = pnand %p1910_p0, %p1904_p11 }
  0x95   :  { %1914 = shalt.err (!%p1911_p1)
}
  0x96   :  { %126 = dma.hbm_to_vmem [thread:$0]  %s2304_s8, 1024, %s121_s20, [#allocation15], %s1954_s14, %s1954_s14, %s1955_s19  }
  0x97   :  { %1937 = dma.done.wait [#allocation3], 32  }
  0x98   :  { %1938 = vsyncadd [#allocation3], 4294967264 }
  0x99   :  { %1939 = dma.done.wait [#allocation6], 1280  }
  0x9a   :  { %1940 = vsyncadd [#allocation6], 4294966016 }
  0x9b   :  { %1941 = dma.done.wait [#allocation9], 2048  }
  0x9c   :  { %1942 = vsyncadd [#allocation9], 4294965248 }
  0x9d   :  { %1943 = dma.done.wait [#allocation12], 2048  }
  0x9e   :  { %1944 = vsyncadd [#allocation12], 4294965248 }
  0x9f   :  { %1945 = dma.done.wait [#allocation15], 2048  }
  0xa0   :  { %1946 = vsyncadd [#allocation15], 4294965248  ;;  %v1962_v0 = vmov 0.0   ;;  %vm1963_vm0 = vmmov 0   ;;  %v1641_v1 = vld [vmem:[#allocation8] sm:$0xff]   ;;  %v1642_v2 = vld [vmem:[#allocation8 + $0x8] sm:$0xff]   ;;  %v169_v49 = vlaneseq }
  0xa1   :  { %1480 = vmatprep.subr.bf16.mxu1 %v1962_v0  ;;  %1460 = vmatprep.subr.bf16.mxu0 %v1962_v0  ;;  %v1643_v3 = vld [vmem:[#allocation7] sm:$0xff]   ;;  %v1645_v4 = vld [vmem:[#allocation7 + $0x8] sm:$0xff]   ;;  %v1644_v5 = vld [vmem:[#allocation8 + $0x10] sm:$0xff]   ;;  %v1964_v47 = vmov 1966171168   ;;  %vm622_vm2 = vcmask 64512  }
  0xa2   :  { %1496 = vmatprep.mubr.msk.bf16.mxu1 %vm1963_vm0, %v1962_v0  ;;  %1476 = vmatprep.mubr.msk.bf16.mxu0 %vm1963_vm0, %v1962_v0  ;;  %v1647_v6 = vld [vmem:[#allocation7 + $0x10] sm:$0xff]   ;;  %v1646_v7 = vld [vmem:[#allocation8 + $0x18] sm:$0xff]   ;;  %v1648_v9 = vld [vmem:[#allocation8 + $0x20] sm:$0xff]   ;;  %v167_v48 = vunpack.c.l.s4 %v1964_v47  ;;  %v170_v51 = vshrl.u32 %v169_v49, 7  ;;  %vm652_vm3 = vcmask 1043456   ;;  %vm1206_vm4 = vcmask 1041409  }
  0xa3   :  { %1481 = vmatpush3.bf16.msra.mxu1 %v1641_v1  ;;  %1461 = vmatpush3.bf16.msra.mxu0 %v1643_v3  ;;  %v1649_v8 = vld [vmem:[#allocation7 + $0x18] sm:$0xff]   ;;  %v1650_v10 = vld [vmem:[#allocation8 + $0x28] sm:$0xff]   ;;  %v1651_v11 = vld [vmem:[#allocation7 + $0x20] sm:$0xff]   ;;  %s1965_s29 = smov [#allocation17]  }
  0xa4   :  { %1482 = vmatprep.subr.bf16.mxu1 %v1962_v0  ;;  %1462 = vmatprep.subr.bf16.mxu0 %v1962_v0  ;;  %v1653_v12 = vld [vmem:[#allocation7 + $0x28] sm:$0xff]   ;;  %v1652_v13 = vld [vmem:[#allocation8 + $0x30] sm:$0xff]   ;;  %v1654_v15 = vld [vmem:[#allocation8 + $0x38] sm:$0xff]   ;;  %v168_v50 = vunpack.c.0.s8 %v167_v48  ;;  %v612_v58 = vsub.s32 0, %v170_v51  ;;  %s1305_s11 = sshll.u32 %s1965_s29, 4  ;;  %s1306_s11 = int_to_ptr.vmem [resolvable:$true] %s1305_s11 }
  0xa5   :  { %v1655_v14 = vld [vmem:[#allocation7 + $0x30] sm:$0xff]   ;;  %v2169_v17 = vld [vmem:[#allocation5 + $0x8] sm:$0xff]  ;;  %v1657_v38 = vld [vmem:[#allocation10] sm:$0xff]   ;;  %s1915_s3 = scalar_lea.vmem %s1306_s11, 32  ;;  %p1920_p3 = scmp.lt.s32.totalorder %s1306_s11, %s1306_s11 }
  0xa6   :  { %v2167_v16 = vld [vmem:[#allocation5] sm:$0xff]  ;;  %v1656_v18 = vld [vmem:[#allocation7 + $0x38] sm:$0xff]   ;;  %v1658_v39 = vld [vmem:[#allocation10 + $0x8] sm:$0xff]   ;;  %v171_v54 = vsub.s32 %v168_v50, %v170_v51  ;;  %p1916_p2 = scmp.ne.s32.totalorder %s1306_s11, %s1915_s3  ;;  %p1921_p4 = scmp.lt.s32.totalorder %s1915_s3, %s1915_s3 }
  0xa7   :  { %1483 = vmatpush3.bf16.msra.mxu1 %v1642_v2  ;;  %1463 = vmatpush3.bf16.msra.mxu0 %v1645_v4  ;;  %v159_v19 = vpack.c.bf16 %v2169_v17, %v2167_v16  ;;  %v1329_v20 = vld [vmem:[%s2305_s9 + $0x1] ss:$0 sm:$0xff]  ;;  %v1320_v24 = vld [vmem:[%s2305_s9] ss:$0 sm:$0xff]  ;;  %v1659_v40 = vld [vmem:[#allocation10 + $0x10] sm:$0xff]  }
  0xa8   :  { %1484 = vmatprep.subr.bf16.mxu1 %v1962_v0  ;;  %1464 = vmatprep.subr.bf16.mxu0 %v1962_v0  ;;  %v1660_v41 = vld [vmem:[#allocation10 + $0x18] sm:$0xff]   ;;  %v1661_v42 = vld [vmem:[#allocation10 + $0x20] sm:$0xff]   ;;  %v1662_v43 = vld [vmem:[#allocation10 + $0x28] sm:$0xff]   ;;  %p1922_p5 = por %p1921_p4, %p1920_p3 }
  0xa9   :  { %v1663_v44 = vld [vmem:[#allocation10 + $0x30] sm:$0xff]   ;;  %v1664_v45 = vld [vmem:[#allocation10 + $0x38] sm:$0xff]   ;;  %v160_v46 = vld [vmem:[#allocation2] sm:$0x3] }
  0xaa   :  { %vm161_vm1 = vcmp.ne.s32.totalorder %v160_v46, 0  ;;  %v1670_v51 = vld [vmem:[#allocation11 + $0x28] sm:$0xff]   ;;  %p1923_p6 = pnand %p1922_p5, %p1916_p2 }
  0xab   :  { %1485 = vmatpush3.bf16.msra.mxu1 %v1644_v5  ;;  %1465 = vmatpush3.bf16.msra.mxu0 %v1647_v6  ;;  %v1318_v52 = vsel %vm161_vm1, 1.0, %v1962_v0 }
  0xac   :  { %1486 = vmatprep.subr.bf16.mxu1 %v1962_v0  ;;  %1466 = vmatprep.subr.bf16.mxu0 %v1962_v0  ;;  %v1319_v53 = vadd.f32 -1.0, %v1318_v52  ;;  %v1671_v52 = vld [vmem:[#allocation11 + $0x30] sm:$0xff]  }
  0xae   :  { %v172_v55 = vrot.slane %v1319_v53, %v171_v54  ;;  %v1672_v53 = vld [vmem:[#allocation11 + $0x38] sm:$0xff]  }
  0xaf   :  { %1487 = vmatpush3.bf16.msra.mxu1 %v1646_v7  ;;  %1467 = vmatpush3.bf16.msra.mxu0 %v1649_v8 }
  0xb0   :  { %1488 = vmatprep.subr.bf16.mxu1 %v1962_v0  ;;  %1468 = vmatprep.subr.bf16.mxu0 %v1962_v0  ;;  %v180_v56 = vrot.slane %v172_v55, %v171_v54  ;;  %v173_v59 = vcombine.high %v172_v55, %v172_v55 }
  0xb2   :  { %v190_v57 = vmul.f32 1e+09, %v180_v56  ;;  %v187_v61 = vrot.slane %v173_v59, %v171_v54 }
  0xb3   :  { %1489 = vmatpush3.bf16.msra.mxu1 %v1648_v9  ;;  %1469 = vmatpush3.bf16.msra.mxu0 %v1651_v11 }
  0xb4   :  { %1490 = vmatprep.subr.bf16.mxu1 %v1962_v0  ;;  %1470 = vmatprep.subr.bf16.mxu0 %v1962_v0  ;;  %v613_v60 = vrot.slane %v190_v57, %v612_v58  ;;  %v191_v5 = vmul.f32 1e+09, %v187_v61 }
  0xb6   :  { %v617_v7 = vrot.slane %v191_v5, %v612_v58 }
  0xb7   :  { %1491 = vmatpush3.bf16.msra.mxu1 %v1650_v10  ;;  %1471 = vmatpush3.bf16.msra.mxu0 %v1653_v12 }
  0xb8   :  { %1492 = vmatprep.subr.bf16.mxu1 %v1962_v0  ;;  %1472 = vmatprep.subr.bf16.mxu0 %v1962_v0 }
  0xbb   :  { %1493 = vmatpush3.bf16.msra.mxu1 %v1652_v13  ;;  %1473 = vmatpush3.bf16.msra.mxu0 %v1655_v14 }
  0xbc   :  { %1494 = vmatprep.subr.bf16.mxu1 %v1962_v0  ;;  %1474 = vmatprep.subr.bf16.mxu0 %v1962_v0 }
  0xbf   :  { %1495 = vmatpush3.bf16.msra.mxu1 %v1654_v15  ;;  %1475 = vmatpush3.bf16.msra.mxu0 %v1656_v18 }
  0xc0   :  { %1520 = vmatprep.subr.bf16.mxu1 %v1962_v0  ;;  %1500 = vmatprep.subr.bf16.mxu0 %v1962_v0 }
  0xc2   :  { %1497 = vmatmul.mubr.bf16.vlgmr.msra.gmra.mrb[0].mxu1 %v159_v19  ;;  %1477 = vmatmul.mubr.bf16.vlgmr.msra.gmra.mrb[0].mxu0 %v159_v19 }
  0xc3   :  { %1522 = vmatprep.mubr.msk.bf16.mxu1 %vm1963_vm0, %v1962_v0  ;;  %1516 = vmatprep.mubr.msk.bf16.mxu0 %vm1963_vm0, %v1962_v0 }
  0xc4   :  { %1501 = vmatpush3.bf16.msra.mxu0 %v1657_v38  ;;  %v1665_v38 = vld [vmem:[#allocation11] sm:$0xff]  }
  0xc5   :  { %1502 = vmatprep.subr.bf16.mxu0 %v1962_v0 }
  0xc8   :  { %1503 = vmatpush3.bf16.msra.mxu0 %v1658_v39  ;;  %v1666_v39 = vld [vmem:[#allocation11 + $0x8] sm:$0xff]  }
  0xc9   :  { %1504 = vmatprep.subr.bf16.mxu0 %v1962_v0 }
  0xcc   :  { %1505 = vmatpush3.bf16.msra.mxu0 %v1659_v40  ;;  %v1667_v40 = vld [vmem:[#allocation11 + $0x10] sm:$0xff]  }
  0xcd   :  { %1506 = vmatprep.subr.bf16.mxu0 %v1962_v0 }
  0xd0   :  { %1507 = vmatpush3.bf16.msra.mxu0 %v1660_v41  ;;  %v1668_v41 = vld [vmem:[#allocation11 + $0x18] sm:$0xff]  }
  0xd1   :  { %1508 = vmatprep.subr.bf16.mxu0 %v1962_v0 }
  0xd4   :  { %1509 = vmatpush3.bf16.msra.mxu0 %v1661_v42  ;;  %v1669_v42 = vld [vmem:[#allocation11 + $0x20] sm:$0xff]  }
  0xd5   :  { %1510 = vmatprep.subr.bf16.mxu0 %v1962_v0 }
  0xd8   :  { %1511 = vmatpush3.bf16.msra.mxu0 %v1662_v43 }
  0xd9   :  { %1512 = vmatprep.subr.bf16.mxu0 %v1962_v0 }
  0xdc   :  { %1513 = vmatpush3.bf16.msra.mxu0 %v1663_v44 }
  0xdd   :  { %1514 = vmatprep.subr.bf16.mxu0 %v1962_v0 }
  0xe0   :  { %1515 = vmatpush3.bf16.msra.mxu0 %v1664_v45 }
  0xe1   :  { %1544 = vmatprep.subr.bf16.mxu0 %v1962_v0 }
  0xe3   :  { %1517 = vmatmul.mubr.bf16.vlgmr.msra.gmra.mrb[4].mxu0 %v159_v19 }
  0xe4   :  { %1560 = vmatprep.mubr.msk.bf16.mxu0 %vm1963_vm0, %v1962_v0  ;;  %1545 = vmatpush3.bf16.msra.mxu0 %v1665_v38 }
  0xe5   :  { %1546 = vmatprep.subr.bf16.mxu0 %v1962_v0 }
  0xe8   :  { %1547 = vmatpush3.bf16.msra.mxu0 %v1666_v39 }
  0xe9   :  { %1548 = vmatprep.subr.bf16.mxu0 %v1962_v0 }
  0xec   :  { %1549 = vmatpush3.bf16.msra.mxu0 %v1667_v40 }
  0xed   :  { %1550 = vmatprep.subr.bf16.mxu0 %v1962_v0 }
  0xf0   :  { %1551 = vmatpush3.bf16.msra.mxu0 %v1668_v41  ;;  %v1359_v41 = vld [vmem:[%s2305_s9 + $0x5] ss:$0 sm:$0xff] }
  0xf1   :  { %1552 = vmatprep.subr.bf16.mxu0 %v1962_v0 }
  0xf4   :  { %1553 = vmatpush3.bf16.msra.mxu0 %v1669_v42 }
  0xf5   :  { %1554 = vmatprep.subr.bf16.mxu0 %v1962_v0 }
  0xf8   :  { %1555 = vmatpush3.bf16.msra.mxu0 %v1670_v51  ;;  %v1686_v51 = vld [vmem:[#allocation14 + $0x28] sm:$0xff]  }
  0xf9   :  { %1556 = vmatprep.subr.bf16.mxu0 %v1962_v0 }
  0xfc   :  { %1557 = vmatpush3.bf16.msra.mxu0 %v1671_v52  ;;  %v1687_v52 = vld [vmem:[#allocation14 + $0x30] sm:$0xff]  }
  0xfd   :  { %1558 = vmatprep.subr.bf16.mxu0 %v1962_v0 }
 0x100   :  { %1559 = vmatpush3.bf16.msra.mxu0 %v1672_v53  ;;  %v1688_v53 = vld [vmem:[#allocation14 + $0x38] sm:$0xff]  }
 0x101   :  { %1584 = vmatprep.subr.bf16.mxu0 %v1962_v0 }
 0x195   :  { %v405_v21 = vpop.f32.mrb[0].mxu1  ;;  %v295_v26 = vpop.f32.mrb[0].mxu0 }
 0x196   :  { %v406_v22 = vadd.f32 %v1329_v20, %v405_v21  ;;  %v1498_v23 = vpop.f32.mrb[1].mxu1  ;;  %v1478_v29 = vpop.f32.mrb[1].mxu0  ;;  %v296_v30 = vadd.f32 %v1320_v24, %v295_v26 }
 0x197   :  { %v408_v25 = vpop.f32.mrb[2].mxu1  ;;  %v298_v31 = vpop.f32.mrb[2].mxu0  ;;  %v1338_v29 = vld [vmem:[%s2305_s9 + $0x2] ss:$0 sm:$0xff] }
 0x198   :  { %v524_v27 = vpack.c.bf16 %v406_v22, %v406_v22  ;;  %v1499_v28 = vpop.f32.mrb[3].mxu1  ;;  %v1479_v32 = vpop.f32.mrb[3].mxu0  ;;  %v409_v33 = vadd.f32 %v1329_v20, %v408_v25  ;;  %v522_v34 = vpack.c.bf16 %v296_v30, %v296_v30  ;;  %v299_v36 = vadd.f32 %v1320_v24, %v298_v31 }
 0x19a   :  { %1521 = vmatpush3.bf16.xpose.msra.mxu1 %v524_v27  ;;  %v525_v35 = vpack.c.bf16 %v409_v33, %v409_v33  ;;  %v523_v37 = vpack.c.bf16 %v299_v36, %v299_v36 }
 0x19b   :  { %1526 = vmatprep.subr.bf16.mxu1 %v1962_v0 }
 0x1a1   :  { %1523 = vmatmul.mubr.bf16.vlgmr.msra.gmra.mrb[4].mxu1 %v522_v34 }
 0x1a2   :  { %1527 = vmatpush3.bf16.xpose.msra.mxu1 %v525_v35  ;;  %1528 = vmatprep.mubr.msk.bf16.mxu1 %vm1963_vm0, %v1962_v0 }
 0x1a3   :  { %1532 = vmatprep.subr.bf16.mxu1 %v1962_v0 }
 0x1a9   :  { %1529 = vmatmul.mubr.bf16.vlgmr.msra.gmra.mrb[8].mxu1 %v523_v37 }
 0x1aa   :  { %1534 = vmatprep.mubr.msk.bf16.mxu1 %vm1963_vm0, %v1962_v0 }
 0x1b6   :  { %v515_v27 = vpop.f32.mrb[4].mxu0 }
 0x1b7   :  { %v1518_v28 = vpop.f32.mrb[5].mxu0  ;;  %v516_v31 = vadd.f32 %v1338_v29, %v515_v27 }
 0x1b8   :  { %v518_v30 = vpop.f32.mrb[6].mxu0 }
 0x1b9   :  { %v1519_v32 = vpop.f32.mrb[7].mxu0  ;;  %v519_v33 = vadd.f32 %v1338_v29, %v518_v30  ;;  %v647_v34 = vpack.c.bf16 %v516_v31, %v516_v31 }
 0x1bb   :  { %v648_v35 = vpack.c.bf16 %v519_v33, %v519_v33  ;;  %v654_v36 = vsel %vm652_vm3, %v647_v34, 0 }
 0x1bc   :  { %1533 = vmatpush3.bf16.msra.mxu1 %v654_v36 }
 0x1bd   :  { %v700_v37 = vsel %vm652_vm3, %v648_v35, 0  ;;  %1538 = vmatprep.subr.bf16.mxu1 %v1962_v0  ;;  %v1358_v35 = vld [vmem:[%s2305_s9 + $0x4] ss:$0 sm:$0xff] }
 0x274   :  { %v560_v62 = vpop.f32.mrb[4].mxu1 }
 0x275   :  { %v606_v63 = vmul.f32 0.17677669, %v560_v62  ;;  %v1524_v1 = vpop.f32.mrb[5].mxu1 }
 0x276   :  { %v563_v2 = vpop.f32.mrb[6].mxu1 }
 0x277   :  { %v1525_v3 = vpop.f32.mrb[7].mxu1  ;;  %v620_v4 = vadd.f32 %v613_v60, %v606_v63  ;;  %v1349_v63 = vld [vmem:[%s2305_s9 + $0x3] ss:$0 sm:$0xff] }
 0x279   :  { %v623_v6 = vsel %vm622_vm2, %v620_v4, -inf }
 0x27a   :  { %624 = vmax.xlane.f32.xlu0 %v623_v6 }
 0x27c   :  { %v600_v8 = vpop.f32.mrb[8].mxu1 }
 0x27d   :  { %v607_v9 = vmul.f32 0.17677669, %v600_v8  ;;  %v1530_v10 = vpop.f32.mrb[9].mxu1 }
 0x27e   :  { %v603_v11 = vpop.f32.mrb[10].mxu1 }
 0x27f   :  { %v1531_v12 = vpop.f32.mrb[11].mxu1  ;;  %v621_v13 = vadd.f32 %v617_v7, %v607_v9  ;;  %v1673_v11 = vld [vmem:[#allocation13] sm:$0xff]  }
 0x280   :  { %v1674_v12 = vld [vmem:[#allocation13 + $0x8] sm:$0xff]  }
 0x281   :  { %v626_v14 = vsel %vm622_vm2, %v621_v13, -inf }
 0x282   :  { %627 = vmax.xlane.f32.xlu0 %v626_v14  ;;  %v1678_v14 = vld [vmem:[#allocation13 + $0x28] sm:$0xff]  }
 0x307   :  { %v625_v15 = vpop.xlane.xlu0 %624 }
 0x308   :  { %v629_v18 = vsub.f32 %v620_v4, %v625_v15  ;;  %v1679_v15 = vld [vmem:[#allocation13 + $0x30] sm:$0xff]  }
 0x30a   :  { %v631_v19 = vmul.f32 1.442695, %v629_v18  ;;  %v1680_v18 = vld [vmem:[#allocation13 + $0x38] sm:$0xff]  }
 0x30c   :  { %1697 = vpow2.f32 %v631_v19 }
 0x30f   :  { %v628_v20 = vpop.xlane.xlu0 %627 }
 0x310   :  { %v630_v21 = vsub.f32 %v621_v13, %v628_v20  ;;  %v1675_v13 = vld [vmem:[#allocation13 + $0x10] sm:$0xff]  }
 0x312   :  { %v633_v22 = vmul.f32 1.442695, %v630_v21 }
 0x314   :  { %1699 = vpow2.f32 %v633_v22 }
 0x316   :  { %v1698_v23 = vpop.eup %1697 }
 0x317   :  { %v635_v24 = vsel %vm622_vm2, %v1698_v23, 0.0 }
 0x318   :  { %636 = vadd.xlane.f32.xlu1 %v635_v24 }
 0x31e   :  { %v1700_v25 = vpop.eup %1699 }
 0x31f   :  { %v638_v26 = vsel %vm622_vm2, %v1700_v25, 0.0 }
 0x320   :  { %639 = vadd.xlane.f32.xlu1 %v638_v26 }
 0x3a5   :  { %v637_v43 = vpop.xlane.xlu1 %636 }
 0x3a6   :  { %1701 = vrcp.f32 %v637_v43 }
 0x3ad   :  { %v640_v44 = vpop.xlane.xlu1 %639 }
 0x3ae   :  { %1703 = vrcp.f32 %v640_v44 }
 0x3b0   :  { %v1702_v45 = vpop.eup %1701 }
 0x3b1   :  { %v643_v46 = vmul.f32 %v1702_v45, %v1698_v23 }
 0x3b3   :  { %v645_v47 = vpack.c.bf16 %v643_v46, %v643_v46  ;;  %v1681_v46 = vld [vmem:[#allocation14] sm:$0xff]  }
 0x3b5   :  { %1535 = vmatmul.mubr.msk.bf16.vlgmr.msra.gmra.mrb[12].mxu1 %vm622_vm2, %v645_v47  ;;  %v1682_v47 = vld [vmem:[#allocation14 + $0x8] sm:$0xff]  }
 0x3b6   :  { %1539 = vmatpush3.bf16.msra.mxu1 %v700_v37  ;;  %1540 = vmatprep.mubr.msk.bf16.mxu1 %vm1963_vm0, %v1962_v0 }
 0x3b7   :  { %1564 = vmatprep.subr.bf16.mxu1 %v1962_v0 }
 0x3b8   :  { %v1704_v48 = vpop.eup %1703 }
 0x3b9   :  { %v644_v49 = vmul.f32 %v1704_v48, %v1700_v25  ;;  %v1683_v48 = vld [vmem:[#allocation14 + $0x10] sm:$0xff]  }
 0x3bb   :  { %v646_v50 = vpack.c.bf16 %v644_v49, %v644_v49  ;;  %v1684_v49 = vld [vmem:[#allocation14 + $0x18] sm:$0xff]  }
 0x3bd   :  { %1541 = vmatmul.mubr.msk.bf16.vlgmr.msra.gmra.mrb[16].mxu1 %vm622_vm2, %v646_v50  ;;  %v1685_v50 = vld [vmem:[#allocation14 + $0x20] sm:$0xff]  }
 0x3be   :  { %1580 = vmatprep.mubr.msk.bf16.mxu1 %vm1963_vm0, %v1962_v0  ;;  %1565 = vmatpush3.bf16.msra.mxu1 %v1673_v11 }
 0x3bf   :  { %1566 = vmatprep.subr.bf16.mxu1 %v1962_v0 }
 0x3c2   :  { %1567 = vmatpush3.bf16.msra.mxu1 %v1674_v12 }
 0x3c3   :  { %1568 = vmatprep.subr.bf16.mxu1 %v1962_v0 }
 0x3c6   :  { %1569 = vmatpush3.bf16.msra.mxu1 %v1675_v13 }
 0x3c7   :  { %1570 = vmatprep.subr.bf16.mxu1 %v1962_v0 }
 0x488   :  { %v690_v54 = vpop.f32.mrb[12].mxu1 }
 0x489   :  { %v1536_v55 = vpop.f32.mrb[13].mxu1 }
 0x48a   :  { %v693_v56 = vpop.f32.mrb[14].mxu1 }
 0x48b   :  { %v1537_v57 = vpop.f32.mrb[15].mxu1 }
 0x490   :  { %v736_v58 = vpop.f32.mrb[16].mxu1 }
 0x491   :  { %v742_v59 = vpack.c.bf16 %v736_v58, %v690_v54  ;;  %v1542_v60 = vpop.f32.mrb[17].mxu1  ;;  %v1360_v54 = vld [vmem:[%s2305_s9 + $0x6] ss:$0 sm:$0xff] }
 0x492   :  { %v739_v61 = vpop.f32.mrb[18].mxu1 }
 0x493   :  { %v1543_v62 = vpop.f32.mrb[19].mxu1  ;;  %1561 = vmatmul.mubr.bf16.vlgmr.msra.gmra.mrb[8].mxu0 %v742_v59 }
 0x494   :  { %1600 = vmatprep.mubr.msk.bf16.mxu0 %vm1963_vm0, %v1962_v0  ;;  %1585 = vmatpush3.bf16.msra.mxu0 %v1681_v46 }
 0x495   :  { %1586 = vmatprep.subr.bf16.mxu0 %v1962_v0 }
 0x498   :  { %1587 = vmatpush3.bf16.msra.mxu0 %v1682_v47 }
 0x499   :  { %1588 = vmatprep.subr.bf16.mxu0 %v1962_v0 }
 0x49c   :  { %1589 = vmatpush3.bf16.msra.mxu0 %v1683_v48 }
 0x49d   :  { %1590 = vmatprep.subr.bf16.mxu0 %v1962_v0 }
 0x4a0   :  { %1591 = vmatpush3.bf16.msra.mxu0 %v1684_v49 }
 0x4a1   :  { %1592 = vmatprep.subr.bf16.mxu0 %v1962_v0 }
 0x4a4   :  { %1593 = vmatpush3.bf16.msra.mxu0 %v1685_v50 }
 0x4a5   :  { %1594 = vmatprep.subr.bf16.mxu0 %v1962_v0 }
 0x4a8   :  { %1595 = vmatpush3.bf16.msra.mxu0 %v1686_v51 }
 0x4a9   :  { %1596 = vmatprep.subr.bf16.mxu0 %v1962_v0 }
 0x4ac   :  { %1597 = vmatpush3.bf16.msra.mxu0 %v1687_v52 }
 0x4ad   :  { %1598 = vmatprep.subr.bf16.mxu0 %v1962_v0 }
 0x4b0   :  { %1599 = vmatpush3.bf16.msra.mxu0 %v1688_v53 }
 0x566   :  { %v846_v1 = vpop.f32.mrb[8].mxu0 }
 0x567   :  { %v847_v2 = vadd.f32 %v1349_v63, %v846_v1  ;;  %v1562_v3 = vpop.f32.mrb[9].mxu0 }
 0x568   :  { %v849_v4 = vpop.f32.mrb[10].mxu0 }
 0x569   :  { %v853_v5 = vadd.f32 %v847_v2, %v2167_v16  ;;  %v850_v6 = vadd.f32 %v1349_v63, %v849_v4  ;;  %v1563_v7 = vpop.f32.mrb[11].mxu0  ;;  %v1676_v16 = vld [vmem:[#allocation13 + $0x18] sm:$0xff]  }
 0x56a   :  { %1571 = vmatpush3.bf16.msra.mxu1 %v1676_v16 }
 0x56b   :  { %v854_v8 = vadd.f32 %v850_v6, %v2169_v17  ;;  %857 = vadd.xlane.f32.xlu0 %v853_v5  ;;  %v864_v9 = vmul.f32 %v853_v5, %v853_v5  ;;  %v1677_v17 = vld [vmem:[#allocation13 + $0x20] sm:$0xff]   ;;  %1572 = vmatprep.subr.bf16.mxu1 %v1962_v0 }
 0x56d   :  { %859 = vadd.xlane.f32.xlu1 %v854_v8  ;;  %v865_v10 = vmul.f32 %v854_v8, %v854_v8 }
 0x56e   :  { %1573 = vmatpush3.bf16.msra.mxu1 %v1677_v17 }
 0x56f   :  { %866 = vadd.xlane.f32.xlu0 %v864_v9  ;;  %1574 = vmatprep.subr.bf16.mxu1 %v1962_v0 }
 0x571   :  { %868 = vadd.xlane.f32.xlu1 %v865_v10 }
 0x572   :  { %1575 = vmatpush3.bf16.msra.mxu1 %v1678_v14 }
 0x573   :  { %1576 = vmatprep.subr.bf16.mxu1 %v1962_v0 }
 0x576   :  { %1577 = vmatpush3.bf16.msra.mxu1 %v1679_v15  ;;  %v1369_v15 = vld [vmem:[%s2305_s9 + $0x7] ss:$0 sm:$0xff] }
 0x577   :  { %1578 = vmatprep.subr.bf16.mxu1 %v1962_v0 }
 0x57a   :  { %1579 = vmatpush3.bf16.msra.mxu1 %v1680_v18 }
 0x57b   :  { %1604 = vmatprep.subr.bf16.mxu1 %v1962_v0 }
 0x5f8   :  { %v858_v19 = vpop.xlane.xlu0 %857 }
 0x5f9   :  { %v862_v20 = vmul.f32 0.03125, %v858_v19 }
 0x5fa   :  { %v860_v21 = vpop.xlane.xlu1 %859 }
 0x5fb   :  { %v863_v22 = vmul.f32 0.03125, %v860_v21  ;;  %v872_v24 = vmul.f32 %v862_v20, %v862_v20  ;;  %v876_v33 = vsub.f32 %v853_v5, %v862_v20 }
 0x5fc   :  { %v867_v23 = vpop.xlane.xlu0 %866 }
 0x5fd   :  { %v870_v25 = vmul.f32 0.03125, %v867_v23  ;;  %v873_v27 = vmul.f32 %v863_v22, %v863_v22  ;;  %v877_v36 = vsub.f32 %v854_v8, %v863_v22 }
 0x5fe   :  { %v869_v26 = vpop.xlane.xlu1 %868 }
 0x5ff   :  { %v874_v28 = vsub.f32 %v870_v25, %v872_v24  ;;  %v871_v29 = vmul.f32 0.03125, %v869_v26 }
 0x601   :  { %v878_v30 = vadd.f32 1e-12, %v874_v28  ;;  %v875_v31 = vsub.f32 %v871_v29, %v873_v27  ;;  %v1689_v28 = vld [vmem:[#allocation16] sm:$0xff]   ;;  %v1690_v29 = vld [vmem:[#allocation16 + $0x8] sm:$0xff]  }
 0x603   :  { %1705 = vrsqrt.f32 %v878_v30  ;;  %v879_v32 = vadd.f32 1e-12, %v875_v31  ;;  %v1691_v30 = vld [vmem:[#allocation16 + $0x10] sm:$0xff]   ;;  %v1692_v31 = vld [vmem:[#allocation16 + $0x18] sm:$0xff]  }
 0x605   :  { %1707 = vrsqrt.f32 %v879_v32  ;;  %v1693_v32 = vld [vmem:[#allocation16 + $0x20] sm:$0xff]  }
 0x60d   :  { %v1706_v34 = vpop.eup %1705 }
 0x60e   :  { %v882_v37 = vmul.f32 %v1706_v34, %v876_v33  ;;  %v1694_v33 = vld [vmem:[#allocation16 + $0x28] sm:$0xff]   ;;  %v1695_v34 = vld [vmem:[#allocation16 + $0x30] sm:$0xff]  }
 0x60f   :  { %v1708_v38 = vpop.eup %1707 }
 0x610   :  { %v883_v39 = vmul.f32 %v1708_v38, %v877_v36  ;;  %v888_v40 = vmul.f32 %v1358_v35, %v882_v37 }
 0x612   :  { %v889_v42 = vmul.f32 %v1358_v35, %v883_v39  ;;  %v894_v43 = vadd.f32 %v1359_v41, %v888_v40  ;;  %v1696_v35 = vld [vmem:[#allocation16 + $0x38] sm:$0xff]  }
 0x614   :  { %v2249_v44 = vadd.f32 %v1359_v41, %v889_v42 }
 0x616   :  { %v896_v45 = vpack.c.bf16 %v2249_v44, %v894_v43 }
 0x618   :  { %1581 = vmatmul.mubr.bf16.vlgmr.msra.gmra.mrb[20].mxu1 %v896_v45 }
 0x619   :  { %1620 = vmatprep.mubr.msk.bf16.mxu1 %vm1963_vm0, %v1962_v0  ;;  %1605 = vmatpush3.bf16.msra.mxu1 %v1689_v28 }
 0x61a   :  { %1606 = vmatprep.subr.bf16.mxu1 %v1962_v0 }
 0x61d   :  { %1607 = vmatpush3.bf16.msra.mxu1 %v1690_v29 }
 0x61e   :  { %1608 = vmatprep.subr.bf16.mxu1 %v1962_v0 }
 0x621   :  { %1609 = vmatpush3.bf16.msra.mxu1 %v1691_v30 }
 0x622   :  { %1610 = vmatprep.subr.bf16.mxu1 %v1962_v0 }
 0x625   :  { %1611 = vmatpush3.bf16.msra.mxu1 %v1692_v31 }
 0x626   :  { %1612 = vmatprep.subr.bf16.mxu1 %v1962_v0 }
 0x629   :  { %1613 = vmatpush3.bf16.msra.mxu1 %v1693_v32 }
 0x62a   :  { %1614 = vmatprep.subr.bf16.mxu1 %v1962_v0 }
 0x62d   :  { %1615 = vmatpush3.bf16.msra.mxu1 %v1694_v33 }
 0x62e   :  { %1616 = vmatprep.subr.bf16.mxu1 %v1962_v0 }
 0x631   :  { %1617 = vmatpush3.bf16.msra.mxu1 %v1695_v34 }
 0x632   :  { %1618 = vmatprep.subr.bf16.mxu1 %v1962_v0  ;;  %v1378_v0 = vld [vmem:[%s2305_s9 + $0x8] ss:$0 sm:$0xff] }
 0x635   :  { %1619 = vmatpush3.bf16.msra.mxu1 %v1696_v35 }
 0x6eb   :  { %v1000_v55 = vpop.f32.mrb[20].mxu1 }
 0x6ec   :  { %v1001_v56 = vadd.f32 %v1360_v54, %v1000_v55  ;;  %v1582_v57 = vpop.f32.mrb[21].mxu1  ;;  %v1379_v55 = vld [vmem:[%s2305_s9 + $0x9] ss:$0 sm:$0xff] }
 0x6ed   :  { %v1003_v58 = vpop.f32.mrb[22].mxu1 }
 0x6ee   :  { %v1009_v59 = vmul.f32 0.044715, %v1001_v56  ;;  %v1004_v60 = vadd.f32 %v1360_v54, %v1003_v58  ;;  %v1583_v61 = vpop.f32.mrb[23].mxu1  ;;  %v1007_v11 = vmul.f32 0.5, %v1001_v56 }
 0x6f0   :  { %v1011_v62 = vmul.f32 %v1009_v59, %v1001_v56  ;;  %v1010_v63 = vmul.f32 0.044715, %v1004_v60  ;;  %v1008_v12 = vmul.f32 0.5, %v1004_v60 }
 0x6f2   :  { %v1013_v1 = vmul.f32 %v1011_v62, %v1001_v56  ;;  %v1012_v2 = vmul.f32 %v1010_v63, %v1004_v60 }
 0x6f4   :  { %v1015_v3 = vadd.f32 %v1013_v1, %v1001_v56  ;;  %v1014_v4 = vmul.f32 %v1012_v2, %v1004_v60 }
 0x6f6   :  { %v1017_v5 = vmul.f32 0.7978846, %v1015_v3  ;;  %v1016_v6 = vadd.f32 %v1014_v4, %v1004_v60 }
 0x6f8   :  { %1709 = vtanh.f32 %v1017_v5  ;;  %v1018_v7 = vmul.f32 0.7978846, %v1016_v6  ;;  %v1380_v5 = vld [vmem:[%s2305_s9 + $0xa] ss:$0 sm:$0xff] }
 0x6fa   :  { %1711 = vtanh.f32 %v1018_v7 }
 0x702   :  { %v1710_v8 = vpop.eup %1709 }
 0x703   :  { %v1021_v9 = vadd.f32 1.0, %v1710_v8 }
 0x704   :  { %v1712_v10 = vpop.eup %1711 }
 0x705   :  { %v1022_v13 = vadd.f32 1.0, %v1712_v10  ;;  %v1023_v16 = vmul.f32 %v1021_v9, %v1007_v11 }
 0x707   :  { %v1024_v17 = vmul.f32 %v1022_v13, %v1008_v12 }
 0x709   :  { %v1025_v14 = vpack.c.bf16 %v1024_v17, %v1023_v16 }
 0x70b   :  { %1601 = vmatmul.mubr.bf16.vlgmr.msra.gmra.mrb[12].mxu0 %v1025_v14 }
 0x7de   :  { %v1129_v18 = vpop.f32.mrb[12].mxu0 }
 0x7df   :  { %v1130_v19 = vadd.f32 %v1369_v15, %v1129_v18  ;;  %v1602_v20 = vpop.f32.mrb[13].mxu0 }
 0x7e0   :  { %v1132_v21 = vpop.f32.mrb[14].mxu0 }
 0x7e1   :  { %v1136_v22 = vadd.f32 %v1130_v19, %v894_v43  ;;  %v1133_v23 = vadd.f32 %v1369_v15, %v1132_v21  ;;  %v1603_v24 = vpop.f32.mrb[15].mxu0 }
 0x7e3   :  { %v1137_v25 = vadd.f32 %v1133_v23, %v2249_v44  ;;  %1140 = vadd.xlane.f32.xlu1 %v1136_v22  ;;  %v1146_v26 = vmul.f32 %v1136_v22, %v1136_v22 }
 0x7e5   :  { %1142 = vadd.xlane.f32.xlu0 %v1137_v25  ;;  %v1147_v27 = vmul.f32 %v1137_v25, %v1137_v25 }
 0x7e7   :  { %1148 = vadd.xlane.f32.xlu1 %v1146_v26 }
 0x7e9   :  { %1150 = vadd.xlane.f32.xlu0 %v1147_v27 }
 0x870   :  { %v1141_v36 = vpop.xlane.xlu1 %1140 }
 0x871   :  { %v1144_v37 = vmul.f32 0.03125, %v1141_v36 }
 0x872   :  { %v1143_v38 = vpop.xlane.xlu0 %1142 }
 0x873   :  { %v1145_v39 = vmul.f32 0.03125, %v1143_v38  ;;  %v1154_v41 = vmul.f32 %v1144_v37, %v1144_v37  ;;  %v1158_v50 = vsub.f32 %v1136_v22, %v1144_v37 }
 0x874   :  { %v1149_v40 = vpop.xlane.xlu1 %1148 }
 0x875   :  { %v1152_v42 = vmul.f32 0.03125, %v1149_v40  ;;  %v1155_v44 = vmul.f32 %v1145_v39, %v1145_v39  ;;  %v1159_v52 = vsub.f32 %v1137_v25, %v1145_v39 }
 0x876   :  { %v1151_v43 = vpop.xlane.xlu0 %1150 }
 0x877   :  { %v1156_v45 = vsub.f32 %v1152_v42, %v1154_v41  ;;  %v1153_v46 = vmul.f32 0.03125, %v1151_v43 }
 0x879   :  { %v1160_v47 = vadd.f32 1e-12, %v1156_v45  ;;  %v1157_v48 = vsub.f32 %v1153_v46, %v1155_v44 }
 0x87b   :  { %1713 = vrsqrt.f32 %v1160_v47  ;;  %v1161_v49 = vadd.f32 1e-12, %v1157_v48 }
 0x87d   :  { %1715 = vrsqrt.f32 %v1161_v49 }
 0x885   :  { %v1714_v51 = vpop.eup %1713 }
 0x886   :  { %v1164_v53 = vmul.f32 %v1714_v51, %v1158_v50 }
 0x887   :  { %v1716_v54 = vpop.eup %1715 }
 0x888   :  { %v1165_v56 = vmul.f32 %v1716_v54, %v1159_v52  ;;  %v1170_v57 = vmul.f32 %v1378_v0, %v1164_v53 }
 0x88a   :  { %v1171_v58 = vmul.f32 %v1378_v0, %v1165_v56  ;;  %v1176_v59 = vadd.f32 %v1379_v55, %v1170_v57 }
 0x88c   :  { %v1177_v60 = vadd.f32 %v1379_v55, %v1171_v58  ;;  %v1178_v61 = vpack.c.bf16 %v1176_v59, %v1176_v59 }
 0x88e   :  { %v1179_v62 = vpack.c.bf16 %v1177_v60, %v1177_v60  ;;  %v1203_v1 = vunpack.c.l.b16 %v1178_v61 }
 0x890   :  { %v1204_v63 = vunpack.c.l.b16 %v1179_v62 }
 0x892   :  { %v1205_v2 = vrot.slane %v1204_v63, 7 }
 0x894   :  { %v1207_v3 = vsel %vm1206_vm4, %v1205_v2, %v1203_v1 }
 0x895   :  { %v1208_v4 = vpack.c.b16 %v1207_v3, %v1207_v3 }
 0x897   :  { %1621 = vmatmul.mubr.bf16.vlgmr.msra.gmra.mrb[24].mxu1 %v1208_v4 }
 0x96a   :  { %v1292_v6 = vpop.f32.mrb[24].mxu1 }
 0x96b   :  { %v1293_v7 = vadd.f32 %v1380_v5, %v1292_v6  ;;  %v1622_v8 = vpop.f32.mrb[25].mxu1 }
 0x96c   :  { %v1295_v9 = vpop.f32.mrb[26].mxu1 }
 0x96d   :  { %1298 = vst [vmem:[#allocation17] sm:$0x3] %v1293_v7  ;;  %v1623_v10 = vpop.f32.mrb[27].mxu1 }
 0x96e   :  { %1926 = shalt.err (!%p1923_p6)
}
 0x96f   :  { %s1927_s9 = scalar_lea.hbm %s2306_s10, 32 }
 0x970   :  { %p1928_p7 = scmp.ne.s32.totalorder %s2306_s10, %s1927_s9  ;;  %p1931_p8 = scmp.lt.u32.totalorder %s1927_s9, %s2306_s10 }
 0x972   :  { %p1933_p9 = pnand %p1931_p8, %p1928_p7 }
 0x974   :  { %1936 = shalt.err (!%p1933_p9)
}
 0x975   :  { %1308 = dma.vmem_to_hbm [thread:$0]  %s1306_s11, 32, %s2306_s10, [#allocation4]  }
 0x976   :  { %1947 = dma.done.wait [#allocation4], 32  }
 0x977   :  { %1948 = vsyncadd [#allocation4], 4294967264 }
 0x978   :  { %1312 = vsyncpa [#allocation3], 1 }
 0x979   :  { %1313 = vsyncpa [#allocation6], 1 }
 0x97a   :  { %1314 = vsyncpa [#allocation9], 1 }
 0x97b   :  { %1315 = vsyncpa [#allocation12], 1 }
 0x97c   :  { %1316 = vsyncpa [#allocation15], 1 }
 0x97d   :  { %1317 = vsyncpa [#allocation4], 1 }

</bundles_post_ra>
